<compile_context>
chip_gen: v7x
topology: tpu7x:2x2x1
jax: 0.10.0
libtpu: 0.0.40
codegen_flags: <defaults>
</compile_context>

<pallas_src>
import jax
import jax.numpy as jnp
from jax.experimental import pallas as pl
from jax.experimental.pallas import tpu as pltpu


_LANE = 128
_MIB = 1024 * 1024


def _round_up(x, m):
    return (x + m - 1) // m * m


def _vmem_budget_bytes():
    """Generation-aware VMEM budget: physical capacity minus headroom for
    Mosaic internal scratch.  ~48 MiB on v7x (64 MiB/TC), ~112 MiB on v5e/v6e."""
    try:
        cap = int(pltpu.get_tpu_info().vmem_capacity_bytes)
    except Exception:
        cap = 64 * _MIB            # conservative fallback (v7x-sized)
    return max(cap - 16 * _MIB, 32 * _MIB)


def _fused_kernel(x_ref, w1_ref, b1_ref, w2_ref, b2_ref, o_ref):
    """One (tm, H_OUT) tile of y = (x @ W1 + b1) @ W2 + b2, weights resident."""
    x = x_ref[...].astype(w1_ref.dtype)          # in-kernel cast, hides under MXU
    h = jnp.dot(x, w1_ref[...], preferred_element_type=jnp.float32)
    h = h + b1_ref[...]                          # f32 epilogue (v5e VPU-safe)
    y = jnp.dot(h.astype(w2_ref.dtype), w2_ref[...],
                preferred_element_type=jnp.float32)
    o_ref[...] = (y + b2_ref[...]).astype(o_ref.dtype)


def _ktiled_kernel(x_ref, w1_ref, b1_ref, w2_ref, b2_ref, o_ref, acc_ref):
    """K-tiled variant: weights streamed in tk-wide chunks over H_MID."""
    k = pl.program_id(1)

    @pl.when(k == 0)
    def _init():
        acc_ref[...] = jnp.zeros_like(acc_ref)

    x = x_ref[...].astype(w1_ref.dtype)
    h = jnp.dot(x, w1_ref[...], preferred_element_type=jnp.float32)   # (tm, tk)
    h = h + b1_ref[...]
    acc_ref[...] += jnp.dot(h.astype(w2_ref.dtype), w2_ref[...],
                            preferred_element_type=jnp.float32)

    @pl.when(k == pl.num_programs(1) - 1)
    def _finalize():
        o_ref[...] = (acc_ref[...] + b2_ref[...]).astype(o_ref.dtype)


def make_composed_forward(w1, b1, w2, b2, *, param_dtype=jnp.bfloat16,
                          out_dtype=None, tm_max=512, force_k_tile=None):
    """Preprocess torch.nn.Linear-layout params once and return a jitted
    forward(x).  w1:[H_MID,H_IN] b1:[H_MID] w2:[H_OUT,H_MID] b2:[H_OUT]."""
    H_MID, H_IN = w1.shape
    H_OUT = w2.shape[0]
    p_bytes = jnp.dtype(param_dtype).itemsize
    budget = _vmem_budget_bytes()

    # --- static path decision: weight-resident vs. K-tiled over H_MID ------
    h_mid_128 = _round_up(H_MID, _LANE)
    resident_w_bytes = (H_IN * h_mid_128 + h_mid_128 * H_OUT) * p_bytes
    # Pallas double-buffers every input BlockSpec, so charge the weights 2x and
    # leave at least half the budget for activation tiles / intermediates.
    use_k_tiling = (force_k_tile is not None) or (2 * resident_w_bytes > budget // 2)

    if use_k_tiling:
        if force_k_tile is not None:
            tk = _round_up(int(force_k_tile), _LANE)
        else:
            tk = (budget // 2) // (2 * (H_IN + H_OUT) * p_bytes)
            tk = max(_LANE, (tk // _LANE) * _LANE)
        tk = min(tk, _round_up(H_MID, _LANE))
        H_MID_P = _round_up(H_MID, tk)   # tk divides H_MID_P exactly
        nk = H_MID_P // tk
    else:
        tk = None
        H_MID_P = h_mid_128
        nk = 1

    # --- one-time parameter prep (transpose to [in,out], zero-pad H_MID) ---
    # Zero padding is exact: padded h columns get zero bias and hit zero W2
    # rows, so they contribute nothing to the output.
    w1_t = jnp.zeros((H_IN, H_MID_P), param_dtype).at[:, :H_MID].set(
        w1.T.astype(param_dtype))
    w2_t = jnp.zeros((H_MID_P, H_OUT), param_dtype).at[:H_MID, :].set(
        w2.T.astype(param_dtype))
    b1_p = jnp.zeros((1, H_MID_P), jnp.float32).at[0, :H_MID].set(
        b1.astype(jnp.float32))
    b2_p = jnp.asarray(b2, jnp.float32).reshape(1, H_OUT)
    w1_t, w2_t, b1_p, b2_p = jax.device_put((w1_t, w2_t, b1_p, b2_p))

    weight_bytes = (H_IN * H_MID_P + H_MID_P * H_OUT) * p_bytes
    if use_k_tiling:
        wstep_bytes = (H_IN * tk + tk * H_OUT) * p_bytes
        bstep_bytes = 8 * (tk + H_OUT) * 4          # (1, .) blocks pad to 8 sublanes
        step_mid = tk
    else:
        wstep_bytes = weight_bytes
        bstep_bytes = 8 * (H_MID_P + H_OUT) * 4
        step_mid = H_MID_P

    @jax.jit
    def forward(x):
        B, S, h_in = x.shape
        assert h_in == H_IN
        M = B * S
        x_bytes = jnp.dtype(x.dtype).itemsize
        o_dtype = jnp.dtype(out_dtype) if out_dtype is not None else x.dtype
        o_bytes = jnp.dtype(o_dtype).itemsize
        min_tm = 8 if (x_bytes == 4 and o_bytes == 4) else 16

        def need(tm):
            return (2 * tm * H_IN * x_bytes          # double-buffered x tiles
                    + 2 * tm * H_OUT * o_bytes       # double-buffered out tiles
                    + 2 * wstep_bytes                # weights, double-buffered
                    + 2 * bstep_bytes                # biases,  double-buffered
                    + tm * step_mid * (4 + p_bytes)  # h (f32) + its cast copy
                    + tm * H_OUT * 4)                # y / accumulator (f32)

        # Row-tile size: as large as fits the VMEM budget, but keep >= 4 grid
        # steps when possible so v7x's 2nd TensorCore gets work and the x/out
        # DMAs have iterations to overlap against.
        if M < min_tm:
            tm = M                                   # single full-dim row block
        else:
            tm = min(tm_max, (M // min_tm) * min_tm)
            while tm > min_tm and need(tm) > budget:
                tm = max(min_tm, _round_up(tm // 2, min_tm))
            while tm > min_tm and pl.cdiv(M, tm) < 4:
                tm = max(min_tm, _round_up(tm // 2, min_tm))

        nm = pl.cdiv(M, tm)
        x2d = x.reshape(M, H_IN)     # free reshape; no pad, no wrapper cast

        cost = pl.CostEstimate(
            flops=2 * M * (H_IN * H_MID_P + H_MID_P * H_OUT),
            transcendentals=0,
            bytes_accessed=int(M * H_IN * x_bytes + weight_bytes
                               + 4 * (H_MID_P + H_OUT) + M * H_OUT * o_bytes))
        vmem_limit = int(need(tm) + 16 * _MIB)       # corrected need + headroom

        if use_k_tiling:
            out = pl.pallas_call(
                _ktiled_kernel,
                out_shape=jax.ShapeDtypeStruct((M, H_OUT), o_dtype),
                grid=(nm, nk),
                in_specs=[
                    pl.BlockSpec((tm, H_IN), lambda i, k: (i, 0)),    # x tile
                    pl.BlockSpec((H_IN, tk), lambda i, k: (0, k)),    # W1 chunk
                    pl.BlockSpec((1, tk), lambda i, k: (0, k)),       # b1 chunk
                    pl.BlockSpec((tk, H_OUT), lambda i, k: (k, 0)),   # W2 chunk
                    pl.BlockSpec((1, H_OUT), lambda i, k: (0, 0)),    # b2
                ],
                out_specs=pl.BlockSpec((tm, H_OUT), lambda i, k: (i, 0)),
                scratch_shapes=[pltpu.VMEM((tm, H_OUT), jnp.float32)],
                compiler_params=pltpu.CompilerParams(
                    dimension_semantics=("parallel", "arbitrary"),
                    vmem_limit_bytes=vmem_limit),
                cost_estimate=cost,
            )(x2d, w1_t, b1_p, w2_t, b2_p)
        else:
            out = pl.pallas_call(
                _fused_kernel,
                out_shape=jax.ShapeDtypeStruct((M, H_OUT), o_dtype),
                grid=(nm,),
                in_specs=[
                    pl.BlockSpec((tm, H_IN), lambda i: (i, 0)),         # x tile
                    pl.BlockSpec((H_IN, H_MID_P), lambda i: (0, 0)),    # W1 resident
                    pl.BlockSpec((1, H_MID_P), lambda i: (0, 0)),       # b1 resident
                    pl.BlockSpec((H_MID_P, H_OUT), lambda i: (0, 0)),   # W2 resident
                    pl.BlockSpec((1, H_OUT), lambda i: (0, 0)),         # b2 resident
                ],
                out_specs=pl.BlockSpec((tm, H_OUT), lambda i: (i, 0)),
                compiler_params=pltpu.CompilerParams(
                    dimension_semantics=("parallel",),
                    vmem_limit_bytes=vmem_limit),
                cost_estimate=cost,
            )(x2d, w1_t, b1_p, w2_t, b2_p)

        return out.reshape(B, S, H_OUT)

    return forward


if __name__ == "__main__":
    # TODO(synk): the tag/kwargs routing of Composable/Composed is pure Python
    # argument plumbing with no tensor semantics; it has no Pallas equivalent.
    B, S = 2, 8
    H_IN, H_MID, H_OUT = 32, 64, 32

    key = jax.random.PRNGKey(0)
    kx, kw1, kb1, kw2, kb2 = jax.random.split(key, 5)
    x = jax.random.normal(kx, (B, S, H_IN), dtype=jnp.float32)

    # Deterministic init mimicking torch.nn.Linear (+/- 1/sqrt(fan_in));
    # weights are [out_features, in_features].
    bound1 = 1.0 / jnp.sqrt(jnp.float32(H_IN))
    bound2 = 1.0 / jnp.sqrt(jnp.float32(H_MID))
    w1 = jax.random.uniform(kw1, (H_MID, H_IN), jnp.float32, -bound1, bound1)
    b1 = jax.random.uniform(kb1, (H_MID,), jnp.float32, -bound1, bound1)
    w2 = jax.random.uniform(kw2, (H_OUT, H_MID), jnp.float32, -bound2, bound2)
    b2 = jax.random.uniform(kb2, (H_OUT,), jnp.float32, -bound2, bound2)

    def reference(x, w1, b1, w2, b2):
        h = jnp.einsum("bsi,oi->bso", x, w1) + b1
        return jnp.einsum("bsm,om->bso", h, w2) + b2

    y_ref = reference(x, w1, b1, w2, b2)

    # 1) f32 accuracy path, weight-resident fused kernel (strict check).
    y32 = make_composed_forward(w1, b1, w2, b2, param_dtype=jnp.float32)(x)
    jax.block_until_ready(y32)
    assert y32.shape == (B, S, H_OUT)
    assert jnp.allclose(y32, y_ref, atol=1e-5, rtol=1e-5)

    # 2) Default bf16 matmul-input path (f32 accumulation); looser tolerance
    #    since x / W are rounded to bf16 before the MXU.
    y16 = make_composed_forward(w1, b1, w2, b2)(x)
    jax.block_until_ready(y16)
    assert y16.shape == (B, S, H_OUT)
    assert jnp.allclose(y16, y_ref, atol=1e-1, rtol=1e-1)

    # 3) K-tiled path (weights streamed over H_MID) forced for coverage:
    #    H_MID=256 with tk=128 -> 2 reduction steps + accumulator scratch.
    H_MID2 = 256
    kw1b, kb1b, kw2b, kb2b = jax.random.split(jax.random.PRNGKey(1), 4)
    bound1b = 1.0 / jnp.sqrt(jnp.float32(H_IN))
    bound2b = 1.0 / jnp.sqrt(jnp.float32(H_MID2))
    w1b = jax.random.uniform(kw1b, (H_MID2, H_IN), jnp.float32, -bound1b, bound1b)
    b1b = jax.random.uniform(kb1b, (H_MID2,), jnp.float32, -bound1b, bound1b)
    w2b = jax.random.uniform(kw2b, (H_OUT, H_MID2), jnp.float32, -bound2b, bound2b)
    b2b = jax.random.uniform(kb2b, (H_OUT,), jnp.float32, -bound2b, bound2b)
    y_ref_b = reference(x, w1b, b1b, w2b, b2b)

    y_kt = make_composed_forward(w1b, b1b, w2b, b2b, param_dtype=jnp.float32,
                                 force_k_tile=128)(x)
    jax.block_until_ready(y_kt)
    assert y_kt.shape == (B, S, H_OUT)
    assert jnp.allclose(y_kt, y_ref_b, atol=1e-4, rtol=1e-4)

    print("KERNEL_OK")
</pallas_src>

<mosaic_0001>
module attributes {stable_mosaic.version = 11 : i64} {
  func.func @_fused_kernel(%arg0: i32, %arg1: memref<8x32xf32, #tpu.memory_space<vmem>>, %arg2: memref<32x128xf32, #tpu.memory_space<vmem>>, %arg3: memref<1x128xf32, #tpu.memory_space<vmem>>, %arg4: memref<128x32xf32, #tpu.memory_space<vmem>>, %arg5: memref<1x32xf32, #tpu.memory_space<vmem>>, %arg6: memref<8x32xf32, #tpu.memory_space<vmem>>) attributes {dimension_semantics = [#tpu.dimension_semantics<parallel>], iteration_bounds = array<i64: 2>, scalar_prefetch = 0 : i64, scratch_operands = 0 : i64, tpu.core_type = #tpu.core_type<tc>, window_params = [{transform_indices = @transform_0, window_bounds = array<i64: 8, 32>}, {pipeline_mode = #tpu.pipeline_mode<synchronous>, transform_indices = @transform_1, window_bounds = array<i64: 32, 128>}, {pipeline_mode = #tpu.pipeline_mode<synchronous>, transform_indices = @transform_2, window_bounds = array<i64: 1, 128>}, {pipeline_mode = #tpu.pipeline_mode<synchronous>, transform_indices = @transform_3, window_bounds = array<i64: 128, 32>}, {pipeline_mode = #tpu.pipeline_mode<synchronous>, transform_indices = @transform_4, window_bounds = array<i64: 1, 32>}, {transform_indices = @transform_5, window_bounds = array<i64: 8, 32>}]} {
    %c0 = arith.constant 0 : index
    %c0_0 = arith.constant 0 : index
    %0 = vector.load %arg1[%c0, %c0_0] : memref<8x32xf32, #tpu.memory_space<vmem>>, vector<8x32xf32>
    %c0_1 = arith.constant 0 : index
    %c0_2 = arith.constant 0 : index
    %1 = vector.load %arg2[%c0_1, %c0_2] : memref<32x128xf32, #tpu.memory_space<vmem>>, vector<32x128xf32>
    %cst = arith.constant dense<0.000000e+00> : vector<8x128xf32>
    %2 = tpu.matmul %0, %1, %cst {dimension_numbers = #tpu.dot_dimension_numbers<[1], [0], [0], [1], [0, 0, 1, 1], [], []>} : vector<8x32xf32>, vector<32x128xf32>, vector<8x128xf32> -> vector<8x128xf32>
    %c0_3 = arith.constant 0 : index
    %c0_4 = arith.constant 0 : index
    %3 = vector.load %arg3[%c0_3, %c0_4] : memref<1x128xf32, #tpu.memory_space<vmem>>, vector<1x128xf32>
    %4 = vector.broadcast %3 : vector<1x128xf32> to vector<8x128xf32>
    %5 = arith.addf %2, %4 : vector<8x128xf32>
    %c0_5 = arith.constant 0 : index
    %c0_6 = arith.constant 0 : index
    %6 = vector.load %arg4[%c0_5, %c0_6] : memref<128x32xf32, #tpu.memory_space<vmem>>, vector<128x32xf32>
    %cst_7 = arith.constant dense<0.000000e+00> : vector<8x32xf32>
    %7 = tpu.matmul %5, %6, %cst_7 {dimension_numbers = #tpu.dot_dimension_numbers<[1], [0], [0], [1], [0, 0, 1, 1], [], []>} : vector<8x128xf32>, vector<128x32xf32>, vector<8x32xf32> -> vector<8x32xf32>
    %c0_8 = arith.constant 0 : index
    %c0_9 = arith.constant 0 : index
    %8 = vector.load %arg5[%c0_8, %c0_9] : memref<1x32xf32, #tpu.memory_space<vmem>>, vector<1x32xf32>
    %9 = vector.broadcast %8 : vector<1x32xf32> to vector<8x32xf32>
    %10 = arith.addf %7, %9 : vector<8x32xf32>
    %c0_10 = arith.constant 0 : index
    %c0_11 = arith.constant 0 : index
    %11 = vector.load %arg6[%c0_10, %c0_11] : memref<8x32xf32, #tpu.memory_space<vmem>>, vector<8x32xf32>
    tpu.vector_store %arg6[%c0_10, %c0_11], %10 {strides = array<i32>} : memref<8x32xf32, #tpu.memory_space<vmem>>, vector<8x32xf32>,
    return
  }
  func.func @transform_0(%arg0: i32) -> (i32, i32) {
    %c0_i32 = arith.constant 0 : i32
    %c0_i32_0 = arith.constant 0 : i32
    return %arg0, %c0_i32 : i32, i32
  }
  func.func @transform_1(%arg0: i32) -> (i32, i32) {
    %c0_i32 = arith.constant 0 : i32
    %c0_i32_0 = arith.constant 0 : i32
    %c0_i32_1 = arith.constant 0 : i32
    return %c0_i32, %c0_i32_0 : i32, i32
  }
  func.func @transform_2(%arg0: i32) -> (i32, i32) {
    %c0_i32 = arith.constant 0 : i32
    %c0_i32_0 = arith.constant 0 : i32
    %c0_i32_1 = arith.constant 0 : i32
    return %c0_i32, %c0_i32_0 : i32, i32
  }
  func.func @transform_3(%arg0: i32) -> (i32, i32) {
    %c0_i32 = arith.constant 0 : i32
    %c0_i32_0 = arith.constant 0 : i32
    %c0_i32_1 = arith.constant 0 : i32
    return %c0_i32, %c0_i32_0 : i32, i32
  }
  func.func @transform_4(%arg0: i32) -> (i32, i32) {
    %c0_i32 = arith.constant 0 : i32
    %c0_i32_0 = arith.constant 0 : i32
    %c0_i32_1 = arith.constant 0 : i32
    return %c0_i32, %c0_i32_0 : i32, i32
  }
  func.func @transform_5(%arg0: i32) -> (i32, i32) {
    %c0_i32 = arith.constant 0 : i32
    %c0_i32_0 = arith.constant 0 : i32
    return %arg0, %c0_i32 : i32, i32
  }
}

</mosaic_0001>

<bundles_post_ra>
// kernel: forward.1
= control target key start
LH: loop header
LB: loop body
LE: loop exit
PB: predicated region body
PF: predicated region fallthrough
CT: control target
= control target key end

     0   :  { %10 = vsyncpa [#allocation3], 0  ;;  %s1182_s0 = inlined_call_operand.hbm [shape: f32[16,32], index: 0, kind: input, shape index: {}]   ;;  %s1183_s1 = inlined_call_operand.hbm [shape: f32[32,128], index: 1, kind: input, shape index: {}]   ;;  %s1184_s2 = inlined_call_operand.vmem [shape: f32[1,128], index: 2, kind: input, shape index: {}]   ;;  %s1185_s3 = inlined_call_operand.hbm [shape: f32[128,32], index: 3, kind: input, shape index: {}]   ;;  %s1186_s4 = inlined_call_operand.vmem [shape: f32[1,32], index: 4, kind: input, shape index: {}]   ;;  %s1187_s5 = inlined_call_operand.hbm [shape: f32[16,32], index: 5, kind: output, shape index: {}]  }
   0x1   :  { %12 = vsyncpa [#allocation3 + $0x1], 0 }
   0x2   :  { %13 = vsyncpa [#allocation6], 0 }
   0x3   :  { %14 = vsyncpa [#allocation4], 0 }
   0x4   :  { %16 = vsyncpa [#allocation4 + $0x1], 0  ;;  %s938_s18 = smov 0   ;;  %s940_s19 = smov 0  }
   0x5   :  { %s942_s20 = smov 0   ;;  %s944_s21 = smov 0  }
   0x6 LB: > { %s959_s22 = sadd.s32 4294967295, %s897_s21   ;;  %s552_s23 = sadd.s32 4294967294, %s897_s21   ;;  %s897_s21 = sphi %s944_s21, %s1207_s21   ;;  %s893_s20 = sphi %s942_s20, %s1206_s20   ;;  %s889_s19 = sphi %s940_s19, %s1205_s19   ;;  %s885_s18 = sphi %s938_s18, %s1204_s18  }
   0x7   : > { %p42_p0 = scmp.ne.s32.totalorder %s889_s19, %s885_s18  ;;  %p1188_p1 = scmp.eq.s32.totalorder %s959_s22, 0 }
   0x8   : > { %p156_p3 = scmp.eq.s32.totalorder %s552_s23, 1  ;;  %p553_p5 = scmp.ge.s32.totalorder %s897_s21, 1 }
   0x9   : > { %p968_p4 = por %p1188_p1, %p42_p0  ;;  %p163_p7 = scmp.lt.s32.totalorder %s897_s21, 3 }
   0xa   : > { %p973_p6 = por %p156_p3, %p42_p0  ;;  %s899_s27 = smov [#allocation5]  }
   0xb   : > { %s1191_s24 = scalar_select %p968_p4, 1, 0 }
   0xc   : > { %s1192_s25 = scalar_select %p973_p6, 1, 0 }
   0xd   : > { %p978_p8 = pnand %p553_p5, %p163_p7  ;;  %s175_s28 = sshll.u32 %s899_s27, 4  ;;  %s982_s28 = int_to_ptr.vmem [resolvable:$true] %s175_s28 }
   0xe   : > { %s900_s30 = smov [#allocation7]   ;;  %s741_s9 = scalar_lea.hbm %s1183_s1, 512 }
   0xf   : > { %p681_p9 = pneg %p978_p8  ;;  %s191_s6 = sshll.u32 %s900_s30, 4  ;;  %s993_s6 = int_to_ptr.vmem [resolvable:$true] %s191_s6 }
  0x10   : > { %p742_p12 = scmp.ne.s32.totalorder %s1183_s1, %s741_s9  ;;  %p748_p5 = scmp.lt.u32.totalorder %s741_s9, %s1183_s1 }
  0x11   : > { %p989_p11 = pnand %p681_p9, %p1188_p1 }
  0x13   : > { %p743_p13 = pneg %p989_p11 }
  0x15   : > { %p744_p0 = pnand %p743_p13, %p742_p12 }
  0x17   : > { %p745_p3 = pneg %p744_p0 }
  0x19   : > { %p750_p7 = pnand %p748_p5, %p745_p3 }
  0x1b   : > { %753 = shalt.err (!%p750_p7)
}
  0x1c   : > { %s754_s14 = scalar_lea.vmem %s982_s28, 512  ;;  %p762_p2 = scmp.lt.s32.totalorder %s982_s28, %s982_s28 }
  0x1d   : > { %p755_p9 = scmp.ne.s32.totalorder %s982_s28, %s754_s14  ;;  %p763_p12 = scmp.lt.s32.totalorder %s754_s14, %s754_s14 }
  0x1f   : > { %p757_p10 = pnand %p755_p9, %p743_p13  ;;  %p764_p0 = por %p763_p12, %p762_p2 }
  0x21   : > { %p758_p1 = pneg %p757_p10 }
  0x23   : > { %p765_p6 = pnand %p764_p0, %p758_p1 }
  0x25   : > { %768 = shalt.err (!%p765_p6)
}
  0x26   : > { %s901_s15 = smov 128   ;;  %s902_s16 = smov 8  }
  0x27   : > { %684 = dma.hbm_to_vmem [thread:$0]  (!%p989_p11), %s1183_s1, 512, %s982_s28, [#allocation6], %s901_s15, %s901_s15, %s902_s16  }
  0x28   : > { %s769_s7 = scalar_lea.hbm %s1185_s3, 2048 }
  0x29   : > { %p770_p2 = scmp.ne.s32.totalorder %s1185_s3, %s769_s7  ;;  %p776_p10 = scmp.lt.u32.totalorder %s769_s7, %s1185_s3 }
  0x2b   : > { %p772_p1 = pnand %p770_p2, %p743_p13 }
  0x2d   : > { %p773_p6 = pneg %p772_p1 }
  0x2f   : > { %p778_p3 = pnand %p776_p10, %p773_p6 }
  0x31   : > { %781 = shalt.err (!%p778_p3)
}
  0x32   : > { %s782_s28 = scalar_lea.vmem %s993_s6, 2048  ;;  %p790_p12 = scmp.lt.s32.totalorder %s993_s6, %s993_s6 }
  0x33   : > { %p783_p5 = scmp.ne.s32.totalorder %s993_s6, %s782_s28  ;;  %p791_p0 = scmp.lt.s32.totalorder %s782_s28, %s782_s28 }
  0x35   : > { %p785_p7 = pnand %p783_p5, %p743_p13  ;;  %p792_p2 = por %p791_p0, %p790_p12 }
  0x37   : > { %p786_p9 = pneg %p785_p7 }
  0x39   : > { %p793_p1 = pnand %p792_p2, %p786_p9 }
  0x3b   : > { %796 = shalt.err (!%p793_p1)
}
  0x3c   : > { %687 = dma.hbm_to_vmem [thread:$0]  (!%p989_p11), %s1185_s3, 2048, %s993_s6, [#allocation6], %s901_s15, %s901_s15, %s902_s16  }
  0x3d   : > { %s1048_s14 = sadd.s32 1, %s897_s21   ;;  %s29_s29 = sadd.s32 1, %s893_s20 }
  0x3e   : > { %s26_s17 = ssub.s32 %s897_s21, %s1048_s14  ;;  %p36_p13 = scmp.ne.s32.totalorder %s893_s20, %s889_s19 }
  0x3f   : > { %p27_p6 = scmp.eq.s32.totalorder %s26_s17, 0  ;;  %p37_p10 = scmp.eq.s32.totalorder %s897_s21, 0 }
  0x40   : > { %p1195_p3 = scmp.eq.s32.totalorder %s959_s22, 1  ;;  %p698_p7 = scmp.lt.s32.totalorder %s897_s21, 2 }
  0x41   : > { %s1064_s27 = scalar_select %p27_p6, %s893_s20, %s29_s29  }
  0x42   : > { %p1058_p5 = por %p1195_p3, %p36_p13  ;;  %p38_p9 = por %p37_p10, %p36_p13 }
  0x43   : > { %s208_s30 = sand.u32 1, %s893_s20   ;;  %s558_s6 = sshll.u32 %s897_s21, 7 }
  0x44   : > { %s1196_s23 = scalar_select %p1058_p5, 1, 0 }
  0x45   : > { %s557_s7 = sshll.u32 %s208_s30, 3  ;;  %s1071_s8 = scalar_lea.hbm %s1182_s0, %s558_s6 }
  0x46   : > { %s212_s9 = scalar_lea.vmem [#allocation2], %s557_s7  ;;  %p1075_p11 = pnand %p698_p7, %p38_p9 }
  0x47   : > { %s219_s10 = sshll.u32 %s212_s9, 4  ;;  %s209_s28 = scalar_lea.sflag [#allocation3], %s208_s30  ;;  %s1073_s10 = int_to_ptr.vmem [resolvable:$true] %s219_s10 }
  0x48   : > { %s797_s12 = scalar_lea.hbm %s1071_s8, 128  ;;  %p799_p0 = pneg %p1075_p11 }
  0x49   : > { %p798_p12 = scmp.ne.s32.totalorder %s1071_s8, %s797_s12  ;;  %s802_s17 = scalar_lea.hbm %s1182_s0, 256 }
  0x4a   : > { %p803_p13 = scmp.lt.u32.totalorder %s1071_s8, %s1182_s0  ;;  %p804_p6 = scmp.lt.u32.totalorder %s802_s17, %s797_s12 }
  0x4b   : > { %p800_p2 = pnand %p799_p0, %p798_p12  ;;  %p806_p3 = scmp.lt.u32.totalorder %s797_s12, %s1071_s8 }
  0x4c   : > { %p805_p10 = por %p804_p6, %p803_p13 }
  0x4d   : > { %p801_p1 = pneg %p800_p2 }
  0x4e   : > { %p807_p7 = por %p806_p3, %p805_p10 }
  0x50   : > { %p808_p9 = pnand %p807_p7, %p801_p1 }
  0x52   : > { %811 = shalt.err (!%p808_p9)
}
  0x53   : > { %s812_s30 = scalar_lea.vmem %s1073_s10, 128  ;;  %s903_s15 = smov [#allocation2]  }
  0x54   : > { %p813_p12 = scmp.ne.s32.totalorder %s1073_s10, %s812_s30  ;;  %s817_s16 = sshll.u32 %s903_s15, 4  ;;  %s818_s16 = int_to_ptr.vmem [resolvable:$false] %s817_s16 }
  0x55   : > { %s819_s9 = scalar_lea.vmem %s818_s16, 256  ;;  %p820_p4 = scmp.lt.s32.totalorder %s1073_s10, %s818_s16 }
  0x56   : > { %p815_p2 = pnand %p813_p12, %p799_p0  ;;  %p821_p13 = scmp.lt.s32.totalorder %s819_s9, %s812_s30 }
  0x58   : > { %p816_p5 = pneg %p815_p2  ;;  %p822_p6 = por %p821_p13, %p820_p4 }
  0x5a   : > { %p823_p10 = pnand %p822_p6, %p816_p5 }
  0x5c   : > { %826 = shalt.err (!%p823_p10)
}
  0x5d   : > { %691 = dma.hbm_to_vmem [thread:$0]  (!%p1075_p11), %s1071_s8, 128, %s1073_s10, %s209_s28  }
  0x5e   : > { %228 = sbr.rel (%p978_p8) target bundleno = 557 (0x22d), region = 40  ;;  %s1107_s12 = sand.u32 (!%p978_p8), 1, %s889_s19  }
  0x5f   : > { %s560_s13 = sshll.u32 (!%p978_p8), %s1107_s12, 3  ;;  %s231_s29 = scalar_lea.sflag (!%p978_p8), [#allocation3], %s1107_s12 }
  0x60   : > { %s1113_s17 = scalar_lea.vmem (!%p978_p8), [#allocation2], %s560_s13  ;;  %p1198_p4 = scmp.ne.s32.totalorder (!%p978_p8), %s1191_s24, 0 }
  0x65   : > { %872 = dma.done.wait (%p1198_p4), %s231_s29, 128  }
  0x66   : > { %874 = vsyncadd (%p1198_p4), %s231_s29, 4294967168  ;;  %p1199_p5 = scmp.eq.s32.totalorder %s959_s22, 0 }
  0x68   : > { %876 = dma.done.wait (%p1199_p5), [#allocation6], 2560   ;;  %p1200_p8 = pmov %p1199_p5 }
  0x69   : > { %v904_v0 = vmov 0.0|0.0   ;;  %vm905_vm0 = vmmov 0   ;;  %v906_v1 = vmov 0.0   ;;  %v270_v2 = vld [vmem:[#allocation5] sm:$0xff]  ;;  %v271_v3 = vld [vmem:[#allocation5 + $0x8] sm:$0xff]  ;;  %v272_v4 = vld [vmem:[#allocation5 + $0x10] sm:$0xff] }
  0x6a   : > { %878 = vsyncadd (%p1200_p8), [#allocation6], 4294964736  ;;  %639 = vmatprep.subr.bf16.mxu0 %v904_v0  ;;  %601 = vmatprep.mubr.msk.f32.mxu0 %vm905_vm0, %v906_v1  ;;  %v640_v5 = vpack.c.bf16 %v271_v3, %v270_v2  ;;  %v273_v6 = vld [vmem:[#allocation5 + $0x18] sm:$0xff]  ;;  %v355_v7 = vld [vmem:[#allocation7] sm:$0xff]  ;;  %vm281_vm1 = vcmask 261120   ;;  %s568_s11 = sshll.u32 %s959_s22, 7 }
  0x6b   : > { %645 = vmatprep.subr.bf16.mxu1 %v904_v0  ;;  %636 = vmatprep.mubr.msk.f32.mxu1 %vm905_vm0, %v906_v1  ;;  %v356_v8 = vld [vmem:[#allocation7 + $0x8] sm:$0xff]  ;;  %v357_v9 = vld [vmem:[#allocation7 + $0x10] sm:$0xff]  ;;  %v358_v10 = vld [vmem:[#allocation7 + $0x18] sm:$0xff]  ;;  %v643_v11 = vpack.c.bf16 %v273_v6, %v272_v4  ;;  %s268_s28 = scalar_lea.vmem [#allocation8], %s560_s13  ;;  %s1137_s15 = scalar_lea.hbm %s1187_s5, %s568_s11 }
  0x6c   : > { %641 = vmatpush3.bf16.msra.mxu0 %v640_v5  ;;  %v646_v12 = vpack.c.bf16 %v356_v8, %v355_v7  ;;  %v649_v13 = vpack.c.bf16 %v358_v10, %v357_v9  ;;  %v359_v14 = vld [vmem:[#allocation7 + $0x20] sm:$0xff]  ;;  %v360_v15 = vld [vmem:[#allocation7 + $0x28] sm:$0xff]  ;;  %v269_v16 = vld [vmem:[%s1113_s17] sm:$0xff]  ;;  %s463_s7 = sshll.u32 %s268_s28, 4  ;;  %s450_s16 = scalar_lea.sflag [#allocation4], %s1107_s12  ;;  %s1139_s7 = int_to_ptr.vmem [resolvable:$true] %s463_s7 }
  0x6d   : > { %642 = vmatprep.subr.bf16.mxu0 %v904_v0  ;;  %v652_v17 = vpack.c.bf16 %v360_v15, %v359_v14  ;;  %v361_v18 = vld [vmem:[#allocation7 + $0x30] sm:$0xff]  ;;  %v362_v19 = vld [vmem:[#allocation7 + $0x38] sm:$0xff]  ;;  %v363_v21 = vld [vmem:[#allocation7 + $0x40] sm:$0xff]  ;;  %s827_s22 = scalar_lea.vmem %s1139_s7, 128  ;;  %p1201_p0 = scmp.ne.s32.totalorder %s1196_s23, 0 }
  0x6e   : > { %647 = vmatpush3.bf16.msra.mxu1 %v646_v12  ;;  %v655_v20 = vpack.c.bf16 %v362_v19, %v361_v18  ;;  %v364_v22 = vld [vmem:[#allocation7 + $0x48] sm:$0xff]  ;;  %v365_v24 = vld [vmem:[#allocation7 + $0x50] sm:$0xff]  ;;  %v366_v25 = vld [vmem:[#allocation7 + $0x58] sm:$0xff]  ;;  %p828_p11 = scmp.ne.s32.totalorder %s1139_s7, %s827_s22  ;;  %s907_s9 = smov [#allocation8]  }
  0x6f   : > { %648 = vmatprep.subr.bf16.mxu1 %v904_v0  ;;  %v658_v23 = vpack.c.bf16 %v364_v22, %v363_v21  ;;  %v661_v26 = vpack.c.bf16 %v366_v25, %v365_v24  ;;  %v367_v27 = vld [vmem:[#allocation7 + $0x60] sm:$0xff]  ;;  %v368_v28 = vld [vmem:[#allocation7 + $0x68] sm:$0xff]  ;;  %v369_v30 = vld [vmem:[#allocation7 + $0x70] sm:$0xff]  ;;  %s831_s13 = sshll.u32 %s907_s9, 4  ;;  %s832_s13 = int_to_ptr.vmem [resolvable:$false] %s831_s13 }
  0x70   : > { %644 = vmatpush3.bf16.msra.mxu0 %v643_v11  ;;  %v664_v29 = vpack.c.bf16 %v368_v28, %v367_v27  ;;  %v370_v31 = vld [vmem:[#allocation7 + $0x78] sm:$0xff]  ;;  %v564_v33 = vld [vmem:[%s1184_s2] ss:$0 sm:$0xff]  ;;  %p829_p1 = pnand %p828_p11, %p1201_p0  ;;  %s833_s29 = scalar_lea.vmem %s832_s13, 256 }
  0x71   : > { %v667_v32 = vpack.c.bf16 %v370_v31, %v369_v30  ;;  %v566_v37 = vld [vmem:[%s1186_s4] ss:$0 sm:$0xff]  ;;  %p834_p7 = scmp.lt.s32.totalorder %s1139_s7, %s832_s13  ;;  %p835_p9 = scmp.lt.s32.totalorder %s833_s29, %s827_s22 }
  0x72   : > { %650 = vmatpush3.bf16.msra.mxu1 %v649_v13  ;;  %p830_p3 = pneg %p829_p1 }
  0x73   : > { %602 = vmatmul.mubr.msk.f32.vlgmr.msra.gmra.mrb[0].mxu0 %vm281_vm1, %v269_v16  ;;  %651 = vmatprep.subr.bf16.mxu1 %v904_v0  ;;  %p836_p12 = por %p835_p9, %p834_p7 }
  0x75   : > { %p837_p2 = pnand %p836_p12, %p830_p3 }
  0x76   : > { %653 = vmatpush3.bf16.msra.mxu1 %v652_v17 }
  0x77   : > { %654 = vmatprep.subr.bf16.mxu1 %v904_v0 }
  0x7a   : > { %656 = vmatpush3.bf16.msra.mxu1 %v655_v20 }
  0x7b   : > { %657 = vmatprep.subr.bf16.mxu1 %v904_v0 }
  0x7e   : > { %659 = vmatpush3.bf16.msra.mxu1 %v658_v23 }
  0x7f   : > { %660 = vmatprep.subr.bf16.mxu1 %v904_v0 }
  0x82   : > { %662 = vmatpush3.bf16.msra.mxu1 %v661_v26 }
  0x83   : > { %663 = vmatprep.subr.bf16.mxu1 %v904_v0 }
  0x86   : > { %665 = vmatpush3.bf16.msra.mxu1 %v664_v29 }
  0x87   : > { %666 = vmatprep.subr.bf16.mxu1 %v904_v0 }
  0x8a   : > { %668 = vmatpush3.bf16.msra.mxu1 %v667_v32 }
 0x146   : > { %v351_v34 = vpop.f32.mrb[0].mxu0 }
 0x147   : > { %v352_v35 = vadd.f32 %v564_v33, %v351_v34  ;;  %v603_v36 = vpop.f32.mrb[1].mxu0 }
 0x149   : > { %637 = vmatmul.mubr.f32.vlgmr.msra.gmra.mrb[0].mxu1 %v352_v35 }
 0x21c   : > { %v444_v38 = vpop.f32.mrb[0].mxu1 }
 0x21d   : > { %v445_v39 = vadd.f32 %v566_v37, %v444_v38  ;;  %v638_v40 = vpop.f32.mrb[1].mxu1 }
 0x21f   : > { %448 = vst.msk [vmem:[%s268_s28] sm:$0xff] %vm281_vm1, %v445_v39 }
 0x220   : > { %840 = shalt.err (!%p837_p2)
}
 0x221   : > { %s841_s12 = scalar_lea.hbm %s1137_s15, 128  ;;  %s845_s26 = scalar_lea.hbm %s1187_s5, 256 }
 0x222   : > { %p842_p13 = scmp.ne.s32.totalorder %s1137_s15, %s841_s12  ;;  %p846_p4 = scmp.lt.u32.totalorder %s1137_s15, %s1187_s5 }
 0x223   : > { %p847_p5 = scmp.lt.u32.totalorder %s845_s26, %s841_s12  ;;  %p849_p11 = scmp.lt.u32.totalorder %s841_s12, %s1137_s15 }
 0x224   : > { %p843_p6 = pnand %p842_p13, %p1201_p0 }
 0x225   : > { %p848_p8 = por %p847_p5, %p846_p4 }
 0x226   : > { %p844_p10 = pneg %p843_p6 }
 0x227   : > { %p850_p1 = por %p849_p11, %p848_p8 }
 0x229   : > { %p851_p3 = pnand %p850_p1, %p844_p10 }
 0x22b   : > { %854 = shalt.err (!%p851_p3)
}
 0x22c   : > { %679 = dma.vmem_to_hbm [thread:$0]  (%p1201_p0), %s1139_s7, 128, %s1137_s15, %s450_s16  }
 0x22d PF: > { %s475_s11 = sand.u32 1, %s885_s18   ;;  %p1202_p7 = scmp.ne.s32.totalorder %s1192_s25, 0 }
 0x22e   : > { %p1203_p9 = scmp.ge.s32.totalorder %s897_s21, 2  ;;  %s476_s28 = scalar_lea.sflag [#allocation4], %s475_s11 }
 0x230   : > { %p693_p12 = pnand %p1203_p9, %p1202_p7 }
 0x232   : > { %880 = dma.done.wait (!%p693_p12), %s476_s28, 128  }
 0x233   : > { %882 = vsyncadd (!%p693_p12), %s476_s28, 4294967168  ;;  %p19_p2 = scmp.ge.s32.totalorder %s1048_s14, 4   ;;  %s1204_s18 = smov %s889_s19 }
 0x234   : > { %s1205_s19 = smov %s893_s20  ;;  %s1206_s20 = smov %s1064_s27 }
 0x235   : > { %s1207_s21 = smov %s1048_s14  ;;  %21 = sbr.rel (!%p19_p2) target bundleno = 6 (0x6), region = 93 }
 0x23c   :  { %481 = vsyncpa [#allocation3], 1 }
 0x23d   :  { %483 = vsyncpa [#allocation3 + $0x1], 1 }
 0x23e   :  { %484 = vsyncpa [#allocation6], 1 }
 0x23f   :  { %485 = vsyncpa [#allocation4], 1 }
 0x240   :  { %487 = vsyncpa [#allocation4 + $0x1], 1 }

</bundles_post_ra>
